<compile_context>
chip_gen: v6e
topology: v6e:2x2x1
jax: 0.10.0
libtpu: 0.0.40
codegen_flags: <defaults>
</compile_context>

<pallas_src>
import numpy as np
import jax
import jax.numpy as jnp
from jax.experimental import pallas as pl
from jax.experimental.pallas import tpu as pltpu

# RoBERTa-style special token ids.
BOS_ID = 0
PAD_ID = 1
EOS_ID = 2
PERIOD_ID = 4  # synthetic id for '.'

B_TILE = 8  # rows (turns) per grid step; sublane-aligned


def _entail_kernel(suffix_lens_ref, ext_desc_ref,   # scalar-prefetch (SMEM)
                   turn_lens_ref, turn_ref,         # inputs (VMEM)
                   ids_ref, mask_ref):              # outputs (VMEM)
    Bt, L = turn_ref.shape                # (B_TILE, max_length)
    K = suffix_lens_ref.shape[0]          # number of templates
    Dp2 = ext_desc_ref.shape[0] // K      # suffix slots per template (D + 2)

    # Lane positions 0..L-1 for every row in the tile.
    pos = jax.lax.broadcasted_iota(jnp.int32, (Bt, L), 1)
    tl = turn_lens_ref[...]               # (Bt, 1) valid turn-token counts
    rel = pos - tl - 2                    # lane index relative to suffix start

    # Shared prefix, built once per tile:
    #   turn_ref already holds BOS at lane 0 and turn token j at lane j+1
    #   (pre-shifted on host), so one select places BOS + turn, one places '.'.
    base = jnp.where(pos <= tl, turn_ref[...], PAD_ID)
    base = jnp.where(rel == -1, PERIOD_ID, base)

    ids_parts = []
    mask_parts = []
    for k in range(K):                    # static unroll over the 4 templates
        ids = base
        # ext_desc already contains [tokens..., '.', EOS, PAD...] per template,
        # so each slot is a single (eq-immediate, select) pair; PAD slots land
        # on lanes that are PAD anyway.
        for j in range(Dp2):
            ids = jnp.where(rel == j, ext_desc_ref[k * Dp2 + j], ids)
        ids_parts.append(ids)
        # total length = tl + dl + 4  <=>  rel < dl + 2 = suffix_lens[k]
        mask_parts.append((rel < suffix_lens_ref[k]).astype(jnp.int32))

    # Single lane-dense (Bt, K*L) unmasked stores.
    ids_ref[...] = jnp.concatenate(ids_parts, axis=-1)
    mask_ref[...] = jnp.concatenate(mask_parts, axis=-1)


def features_entail(turn_lens, desc_lens, turn_toks, desc_toks, max_length):
    """Builds (in_ids, in_mask) of shape (B, K, max_length), int32."""
    B, T = turn_toks.shape
    K, D = desc_toks.shape
    L = max_length
    # TODO(synk): if tl + dl + 4 > L, RoBERTa would truncate; we require fit.
    assert T + D + 4 <= L, "sequence budget exceeds max_length"

    # --- tiny host-side prep (O(K*D) elements, traced once) -----------------
    # ext_desc[k] = [desc tokens..., '.', EOS, PAD...]  (Dp2 = D + 2 slots)
    Dp2 = D + 2
    col = jnp.arange(Dp2, dtype=jnp.int32)[None, :]
    dl = desc_lens.astype(jnp.int32)[:, None]
    desc_pad = jnp.concatenate(
        [desc_toks.astype(jnp.int32),
         jnp.full((K, 2), PAD_ID, dtype=jnp.int32)], axis=1)
    ext_desc = jnp.where(col < dl, desc_pad, PAD_ID)
    ext_desc = jnp.where(col == dl, PERIOD_ID, ext_desc)
    ext_desc = jnp.where(col == dl + 1, EOS_ID, ext_desc)
    ext_desc = ext_desc.reshape(K * Dp2)                  # flat 1-D SMEM table
    suffix_lens = desc_lens.astype(jnp.int32) + 2         # dl + ('.' , EOS)

    n_blocks = pl.cdiv(B, B_TILE)
    B_pad = n_blocks * B_TILE

    # Lane-major padded turn tokens: BOS at lane 0, token j of row b at lane
    # j+1 (the static shift-by-1 for BOS is folded into the input layout).
    turn_lane = jnp.zeros((B_pad, L), dtype=jnp.int32)
    turn_lane = turn_lane.at[:B, 1:T + 1].set(turn_toks.astype(jnp.int32))
    turn_lane = turn_lane.at[:, 0].set(BOS_ID)
    lens_col = jnp.zeros((B_pad, 1), dtype=jnp.int32)
    lens_col = lens_col.at[:B, 0].set(turn_lens.astype(jnp.int32))

    grid_spec = pltpu.PrefetchScalarGridSpec(
        num_scalar_prefetch=2,            # suffix_lens, ext_desc -> SMEM
        grid=(n_blocks,),
        in_specs=[
            pl.BlockSpec((B_TILE, 1), lambda i, *_: (i, 0)),
            pl.BlockSpec((B_TILE, L), lambda i, *_: (i, 0)),
        ],
        out_specs=[
            pl.BlockSpec((B_TILE, K * L), lambda i, *_: (i, 0)),
            pl.BlockSpec((B_TILE, K * L), lambda i, *_: (i, 0)),
        ],
    )

    ids_flat, mask_flat = pl.pallas_call(
        _entail_kernel,
        grid_spec=grid_spec,
        out_shape=(
            jax.ShapeDtypeStruct((B_pad, K * L), jnp.int32),
            jax.ShapeDtypeStruct((B_pad, K * L), jnp.int32),
        ),
        compiler_params=pltpu.CompilerParams(
            dimension_semantics=("parallel",)),
    )(suffix_lens, ext_desc, lens_col, turn_lane)

    in_ids = ids_flat[:B].reshape(B, K, L)
    in_mask = mask_flat[:B].reshape(B, K, L)
    return in_ids, in_mask


# ---------------------------------------------------------------------------
# Deterministic synthetic "tokenizer" for the 4 entailment templates.
# ---------------------------------------------------------------------------
_TEMPLATES = [
    "Fluent speech",
    "Talking around words or empty speech",
    "Word repetition or revision",
    "Agrammatism or paragrammatism in speech",
]


def _tokenize_templates(d_max):
    vocab = {}
    tok = np.zeros((len(_TEMPLATES), d_max), dtype=np.int32)
    lens = np.zeros((len(_TEMPLATES),), dtype=np.int32)
    for i, text in enumerate(_TEMPLATES):
        words = text.lower().split()
        for j, w in enumerate(words):
            if w not in vocab:
                vocab[w] = 10 + len(vocab)  # ids above special tokens
            tok[i, j] = vocab[w]
        lens[i] = len(words)
    return tok, lens


def _reference(turn_lens, desc_lens, turn_toks, desc_toks, L):
    """Pure-numpy reference for correctness checking."""
    B, _ = turn_toks.shape
    K, _ = desc_toks.shape
    ids = np.full((B, K, L), PAD_ID, dtype=np.int32)
    mask = np.zeros((B, K, L), dtype=np.int32)
    for b in range(B):
        for k in range(K):
            tl = int(turn_lens[b]); dl = int(desc_lens[k])
            seq = ([BOS_ID] + list(turn_toks[b, :tl]) + [PERIOD_ID]
                   + list(desc_toks[k, :dl]) + [PERIOD_ID, EOS_ID])
            ids[b, k, :len(seq)] = seq
            mask[b, k, :len(seq)] = 1
    return ids, mask


if __name__ == "__main__":
    B = 2          # number of turns
    K = 4          # number of entailment templates (len(self.dict))
    L = 128        # max_length (small stand-in for RoBERTa's 512)
    T_MAX = 32     # max turn-token budget
    D_MAX = 16     # max template-token budget

    key = jax.random.PRNGKey(0)
    k_len, k_tok = jax.random.split(key)

    # Synthetic "tokenized" turns (ids of content words), deterministic.
    turn_lens = jax.random.randint(k_len, (B,), 5, T_MAX + 1, dtype=jnp.int32)
    turn_toks = jax.random.randint(k_tok, (B, T_MAX), 10, 30000,
                                   dtype=jnp.int32)

    desc_np, desc_lens_np = _tokenize_templates(D_MAX)
    desc_toks = jnp.asarray(desc_np)            # (K, D_MAX) lane-major
    desc_lens = jnp.asarray(desc_lens_np)       # (K,)

    in_ids, in_mask = features_entail(turn_lens, desc_lens,
                                      turn_toks, desc_toks, L)
    jax.block_until_ready((in_ids, in_mask))

    ref_ids, ref_mask = _reference(np.asarray(turn_lens),
                                   np.asarray(desc_lens),
                                   np.asarray(turn_toks),
                                   np.asarray(desc_toks), L)
    assert np.array_equal(np.asarray(in_ids), ref_ids), "input_ids mismatch"
    assert np.array_equal(np.asarray(in_mask), ref_mask), "attention_mask mismatch"

    print("KERNEL_OK")
</pallas_src>

<mosaic_0001>
module attributes {stable_mosaic.version = 11 : i64} {
  func.func @_entail_kernel(%arg0: i32, %arg1: memref<4xi32, #tpu.memory_space<smem>>, %arg2: memref<72xi32, #tpu.memory_space<smem>>, %arg3: memref<8x1xi32, #tpu.memory_space<vmem>>, %arg4: memref<8x128xi32, #tpu.memory_space<vmem>>, %arg5: memref<8x512xi32, #tpu.memory_space<vmem>>, %arg6: memref<8x512xi32, #tpu.memory_space<vmem>>) attributes {dimension_semantics = [#tpu.dimension_semantics<parallel>], iteration_bounds = array<i64: 1>, scalar_prefetch = 2 : i64, scratch_operands = 0 : i64, tpu.core_type = #tpu.core_type<tc>, window_params = [{transform_indices = @transform_0, window_bounds = array<i64: 8, 1>}, {transform_indices = @transform_1, window_bounds = array<i64: 8, 128>}, {transform_indices = @transform_2, window_bounds = array<i64: 8, 512>}, {transform_indices = @transform_3, window_bounds = array<i64: 8, 512>}]} {
    %0 = tpu.iota {dimensions = array<i32: 1>} : vector<8x128xi32>
    %c0 = arith.constant 0 : index
    %c0_0 = arith.constant 0 : index
    %1 = vector.load %arg3[%c0, %c0_0] : memref<8x1xi32, #tpu.memory_space<vmem>>, vector<8x1xi32>
    %2 = vector.broadcast %1 : vector<8x1xi32> to vector<8x128xi32>
    %3 = arith.subi %0, %2 : vector<8x128xi32>
    %c2_i32 = arith.constant 2 : i32
    %4 = vector.broadcast %c2_i32 : i32 to vector<8x128xi32>
    %5 = arith.subi %3, %4 : vector<8x128xi32>
    %6 = vector.broadcast %1 : vector<8x1xi32> to vector<8x128xi32>
    %7 = arith.cmpi sle, %0, %6 : vector<8x128xi32>
    %c0_1 = arith.constant 0 : index
    %c0_2 = arith.constant 0 : index
    %8 = vector.load %arg4[%c0_1, %c0_2] : memref<8x128xi32, #tpu.memory_space<vmem>>, vector<8x128xi32>
    %c1_i32 = arith.constant 1 : i32
    %9 = vector.broadcast %c1_i32 : i32 to vector<8x128xi32>
    %10 = arith.select %7, %8, %9 : vector<8x128xi1>, vector<8x128xi32>
    %c-1_i32 = arith.constant -1 : i32
    %11 = vector.broadcast %c-1_i32 : i32 to vector<8x128xi32>
    %12 = arith.cmpi eq, %5, %11 : vector<8x128xi32>
    %c4_i32 = arith.constant 4 : i32
    %13 = vector.broadcast %c4_i32 : i32 to vector<8x128xi32>
    %14 = arith.select %12, %13, %10 : vector<8x128xi1>, vector<8x128xi32>
    %c0_i32 = arith.constant 0 : i32
    %15 = vector.broadcast %c0_i32 : i32 to vector<8x128xi32>
    %16 = arith.cmpi eq, %5, %15 : vector<8x128xi32>
    %c0_3 = arith.constant 0 : index
    %17 = memref.load %arg2[%c0_3] : memref<72xi32, #tpu.memory_space<smem>>
    %18 = vector.broadcast %17 : i32 to vector<8x128xi32>
    %19 = arith.select %16, %18, %14 : vector<8x128xi1>, vector<8x128xi32>
    %c1_i32_4 = arith.constant 1 : i32
    %20 = vector.broadcast %c1_i32_4 : i32 to vector<8x128xi32>
    %21 = arith.cmpi eq, %5, %20 : vector<8x128xi32>
    %c1 = arith.constant 1 : index
    %22 = memref.load %arg2[%c1] : memref<72xi32, #tpu.memory_space<smem>>
    %23 = vector.broadcast %22 : i32 to vector<8x128xi32>
    %24 = arith.select %21, %23, %19 : vector<8x128xi1>, vector<8x128xi32>
    %c2_i32_5 = arith.constant 2 : i32
    %25 = vector.broadcast %c2_i32_5 : i32 to vector<8x128xi32>
    %26 = arith.cmpi eq, %5, %25 : vector<8x128xi32>
    %c2 = arith.constant 2 : index
    %27 = memref.load %arg2[%c2] : memref<72xi32, #tpu.memory_space<smem>>
    %28 = vector.broadcast %27 : i32 to vector<8x128xi32>
    %29 = arith.select %26, %28, %24 : vector<8x128xi1>, vector<8x128xi32>
    %c3_i32 = arith.constant 3 : i32
    %30 = vector.broadcast %c3_i32 : i32 to vector<8x128xi32>
    %31 = arith.cmpi eq, %5, %30 : vector<8x128xi32>
    %c3 = arith.constant 3 : index
    %32 = memref.load %arg2[%c3] : memref<72xi32, #tpu.memory_space<smem>>
    %33 = vector.broadcast %32 : i32 to vector<8x128xi32>
    %34 = arith.select %31, %33, %29 : vector<8x128xi1>, vector<8x128xi32>
    %c4_i32_6 = arith.constant 4 : i32
    %35 = vector.broadcast %c4_i32_6 : i32 to vector<8x128xi32>
    %36 = arith.cmpi eq, %5, %35 : vector<8x128xi32>
    %c4 = arith.constant 4 : index
    %37 = memref.load %arg2[%c4] : memref<72xi32, #tpu.memory_space<smem>>
    %38 = vector.broadcast %37 : i32 to vector<8x128xi32>
    %39 = arith.select %36, %38, %34 : vector<8x128xi1>, vector<8x128xi32>
    %c5_i32 = arith.constant 5 : i32
    %40 = vector.broadcast %c5_i32 : i32 to vector<8x128xi32>
    %41 = arith.cmpi eq, %5, %40 : vector<8x128xi32>
    %c5 = arith.constant 5 : index
    %42 = memref.load %arg2[%c5] : memref<72xi32, #tpu.memory_space<smem>>
    %43 = vector.broadcast %42 : i32 to vector<8x128xi32>
    %44 = arith.select %41, %43, %39 : vector<8x128xi1>, vector<8x128xi32>
    %c6_i32 = arith.constant 6 : i32
    %45 = vector.broadcast %c6_i32 : i32 to vector<8x128xi32>
    %46 = arith.cmpi eq, %5, %45 : vector<8x128xi32>
    %c6 = arith.constant 6 : index
    %47 = memref.load %arg2[%c6] : memref<72xi32, #tpu.memory_space<smem>>
    %48 = vector.broadcast %47 : i32 to vector<8x128xi32>
    %49 = arith.select %46, %48, %44 : vector<8x128xi1>, vector<8x128xi32>
    %c7_i32 = arith.constant 7 : i32
    %50 = vector.broadcast %c7_i32 : i32 to vector<8x128xi32>
    %51 = arith.cmpi eq, %5, %50 : vector<8x128xi32>
    %c7 = arith.constant 7 : index
    %52 = memref.load %arg2[%c7] : memref<72xi32, #tpu.memory_space<smem>>
    %53 = vector.broadcast %52 : i32 to vector<8x128xi32>
    %54 = arith.select %51, %53, %49 : vector<8x128xi1>, vector<8x128xi32>
    %c8_i32 = arith.constant 8 : i32
    %55 = vector.broadcast %c8_i32 : i32 to vector<8x128xi32>
    %56 = arith.cmpi eq, %5, %55 : vector<8x128xi32>
    %c8 = arith.constant 8 : index
    %57 = memref.load %arg2[%c8] : memref<72xi32, #tpu.memory_space<smem>>
    %58 = vector.broadcast %57 : i32 to vector<8x128xi32>
    %59 = arith.select %56, %58, %54 : vector<8x128xi1>, vector<8x128xi32>
    %c9_i32 = arith.constant 9 : i32
    %60 = vector.broadcast %c9_i32 : i32 to vector<8x128xi32>
    %61 = arith.cmpi eq, %5, %60 : vector<8x128xi32>
    %c9 = arith.constant 9 : index
    %62 = memref.load %arg2[%c9] : memref<72xi32, #tpu.memory_space<smem>>
    %63 = vector.broadcast %62 : i32 to vector<8x128xi32>
    %64 = arith.select %61, %63, %59 : vector<8x128xi1>, vector<8x128xi32>
    %c10_i32 = arith.constant 10 : i32
    %65 = vector.broadcast %c10_i32 : i32 to vector<8x128xi32>
    %66 = arith.cmpi eq, %5, %65 : vector<8x128xi32>
    %c10 = arith.constant 10 : index
    %67 = memref.load %arg2[%c10] : memref<72xi32, #tpu.memory_space<smem>>
    %68 = vector.broadcast %67 : i32 to vector<8x128xi32>
    %69 = arith.select %66, %68, %64 : vector<8x128xi1>, vector<8x128xi32>
    %c11_i32 = arith.constant 11 : i32
    %70 = vector.broadcast %c11_i32 : i32 to vector<8x128xi32>
    %71 = arith.cmpi eq, %5, %70 : vector<8x128xi32>
    %c11 = arith.constant 11 : index
    %72 = memref.load %arg2[%c11] : memref<72xi32, #tpu.memory_space<smem>>
    %73 = vector.broadcast %72 : i32 to vector<8x128xi32>
    %74 = arith.select %71, %73, %69 : vector<8x128xi1>, vector<8x128xi32>
    %c12_i32 = arith.constant 12 : i32
    %75 = vector.broadcast %c12_i32 : i32 to vector<8x128xi32>
    %76 = arith.cmpi eq, %5, %75 : vector<8x128xi32>
    %c12 = arith.constant 12 : index
    %77 = memref.load %arg2[%c12] : memref<72xi32, #tpu.memory_space<smem>>
    %78 = vector.broadcast %77 : i32 to vector<8x128xi32>
    %79 = arith.select %76, %78, %74 : vector<8x128xi1>, vector<8x128xi32>
    %c13_i32 = arith.constant 13 : i32
    %80 = vector.broadcast %c13_i32 : i32 to vector<8x128xi32>
    %81 = arith.cmpi eq, %5, %80 : vector<8x128xi32>
    %c13 = arith.constant 13 : index
    %82 = memref.load %arg2[%c13] : memref<72xi32, #tpu.memory_space<smem>>
    %83 = vector.broadcast %82 : i32 to vector<8x128xi32>
    %84 = arith.select %81, %83, %79 : vector<8x128xi1>, vector<8x128xi32>
    %c14_i32 = arith.constant 14 : i32
    %85 = vector.broadcast %c14_i32 : i32 to vector<8x128xi32>
    %86 = arith.cmpi eq, %5, %85 : vector<8x128xi32>
    %c14 = arith.constant 14 : index
    %87 = memref.load %arg2[%c14] : memref<72xi32, #tpu.memory_space<smem>>
    %88 = vector.broadcast %87 : i32 to vector<8x128xi32>
    %89 = arith.select %86, %88, %84 : vector<8x128xi1>, vector<8x128xi32>
    %c15_i32 = arith.constant 15 : i32
    %90 = vector.broadcast %c15_i32 : i32 to vector<8x128xi32>
    %91 = arith.cmpi eq, %5, %90 : vector<8x128xi32>
    %c15 = arith.constant 15 : index
    %92 = memref.load %arg2[%c15] : memref<72xi32, #tpu.memory_space<smem>>
    %93 = vector.broadcast %92 : i32 to vector<8x128xi32>
    %94 = arith.select %91, %93, %89 : vector<8x128xi1>, vector<8x128xi32>
    %c16_i32 = arith.constant 16 : i32
    %95 = vector.broadcast %c16_i32 : i32 to vector<8x128xi32>
    %96 = arith.cmpi eq, %5, %95 : vector<8x128xi32>
    %c16 = arith.constant 16 : index
    %97 = memref.load %arg2[%c16] : memref<72xi32, #tpu.memory_space<smem>>
    %98 = vector.broadcast %97 : i32 to vector<8x128xi32>
    %99 = arith.select %96, %98, %94 : vector<8x128xi1>, vector<8x128xi32>
    %c17_i32 = arith.constant 17 : i32
    %100 = vector.broadcast %c17_i32 : i32 to vector<8x128xi32>
    %101 = arith.cmpi eq, %5, %100 : vector<8x128xi32>
    %c17 = arith.constant 17 : index
    %102 = memref.load %arg2[%c17] : memref<72xi32, #tpu.memory_space<smem>>
    %103 = vector.broadcast %102 : i32 to vector<8x128xi32>
    %104 = arith.select %101, %103, %99 : vector<8x128xi1>, vector<8x128xi32>
    %c0_7 = arith.constant 0 : index
    %105 = memref.load %arg1[%c0_7] : memref<4xi32, #tpu.memory_space<smem>>
    %106 = vector.broadcast %105 : i32 to vector<8x128xi32>
    %107 = arith.cmpi slt, %5, %106 : vector<8x128xi32>
    %108 = arith.extui %107 : vector<8x128xi1> to vector<8x128xi32>
    %c0_i32_8 = arith.constant 0 : i32
    %109 = vector.broadcast %c0_i32_8 : i32 to vector<8x128xi32>
    %110 = arith.cmpi eq, %5, %109 : vector<8x128xi32>
    %c18 = arith.constant 18 : index
    %111 = memref.load %arg2[%c18] : memref<72xi32, #tpu.memory_space<smem>>
    %112 = vector.broadcast %111 : i32 to vector<8x128xi32>
    %113 = arith.select %110, %112, %14 : vector<8x128xi1>, vector<8x128xi32>
    %c1_i32_9 = arith.constant 1 : i32
    %114 = vector.broadcast %c1_i32_9 : i32 to vector<8x128xi32>
    %115 = arith.cmpi eq, %5, %114 : vector<8x128xi32>
    %c19 = arith.constant 19 : index
    %116 = memref.load %arg2[%c19] : memref<72xi32, #tpu.memory_space<smem>>
    %117 = vector.broadcast %116 : i32 to vector<8x128xi32>
    %118 = arith.select %115, %117, %113 : vector<8x128xi1>, vector<8x128xi32>
    %c2_i32_10 = arith.constant 2 : i32
    %119 = vector.broadcast %c2_i32_10 : i32 to vector<8x128xi32>
    %120 = arith.cmpi eq, %5, %119 : vector<8x128xi32>
    %c20 = arith.constant 20 : index
    %121 = memref.load %arg2[%c20] : memref<72xi32, #tpu.memory_space<smem>>
    %122 = vector.broadcast %121 : i32 to vector<8x128xi32>
    %123 = arith.select %120, %122, %118 : vector<8x128xi1>, vector<8x128xi32>
    %c3_i32_11 = arith.constant 3 : i32
    %124 = vector.broadcast %c3_i32_11 : i32 to vector<8x128xi32>
    %125 = arith.cmpi eq, %5, %124 : vector<8x128xi32>
    %c21 = arith.constant 21 : index
    %126 = memref.load %arg2[%c21] : memref<72xi32, #tpu.memory_space<smem>>
    %127 = vector.broadcast %126 : i32 to vector<8x128xi32>
    %128 = arith.select %125, %127, %123 : vector<8x128xi1>, vector<8x128xi32>
    %c4_i32_12 = arith.constant 4 : i32
    %129 = vector.broadcast %c4_i32_12 : i32 to vector<8x128xi32>
    %130 = arith.cmpi eq, %5, %129 : vector<8x128xi32>
    %c22 = arith.constant 22 : index
    %131 = memref.load %arg2[%c22] : memref<72xi32, #tpu.memory_space<smem>>
    %132 = vector.broadcast %131 : i32 to vector<8x128xi32>
    %133 = arith.select %130, %132, %128 : vector<8x128xi1>, vector<8x128xi32>
    %c5_i32_13 = arith.constant 5 : i32
    %134 = vector.broadcast %c5_i32_13 : i32 to vector<8x128xi32>
    %135 = arith.cmpi eq, %5, %134 : vector<8x128xi32>
    %c23 = arith.constant 23 : index
    %136 = memref.load %arg2[%c23] : memref<72xi32, #tpu.memory_space<smem>>
    %137 = vector.broadcast %136 : i32 to vector<8x128xi32>
    %138 = arith.select %135, %137, %133 : vector<8x128xi1>, vector<8x128xi32>
    %c6_i32_14 = arith.constant 6 : i32
    %139 = vector.broadcast %c6_i32_14 : i32 to vector<8x128xi32>
    %140 = arith.cmpi eq, %5, %139 : vector<8x128xi32>
    %c24 = arith.constant 24 : index
    %141 = memref.load %arg2[%c24] : memref<72xi32, #tpu.memory_space<smem>>
    %142 = vector.broadcast %141 : i32 to vector<8x128xi32>
    %143 = arith.select %140, %142, %138 : vector<8x128xi1>, vector<8x128xi32>
    %c7_i32_15 = arith.constant 7 : i32
    %144 = vector.broadcast %c7_i32_15 : i32 to vector<8x128xi32>
    %145 = arith.cmpi eq, %5, %144 : vector<8x128xi32>
    %c25 = arith.constant 25 : index
    %146 = memref.load %arg2[%c25] : memref<72xi32, #tpu.memory_space<smem>>
    %147 = vector.broadcast %146 : i32 to vector<8x128xi32>
    %148 = arith.select %145, %147, %143 : vector<8x128xi1>, vector<8x128xi32>
    %c8_i32_16 = arith.constant 8 : i32
    %149 = vector.broadcast %c8_i32_16 : i32 to vector<8x128xi32>
    %150 = arith.cmpi eq, %5, %149 : vector<8x128xi32>
    %c26 = arith.constant 26 : index
    %151 = memref.load %arg2[%c26] : memref<72xi32, #tpu.memory_space<smem>>
    %152 = vector.broadcast %151 : i32 to vector<8x128xi32>
    %153 = arith.select %150, %152, %148 : vector<8x128xi1>, vector<8x128xi32>
    %c9_i32_17 = arith.constant 9 : i32
    %154 = vector.broadcast %c9_i32_17 : i32 to vector<8x128xi32>
    %155 = arith.cmpi eq, %5, %154 : vector<8x128xi32>
    %c27 = arith.constant 27 : index
    %156 = memref.load %arg2[%c27] : memref<72xi32, #tpu.memory_space<smem>>
    %157 = vector.broadcast %156 : i32 to vector<8x128xi32>
    %158 = arith.select %155, %157, %153 : vector<8x128xi1>, vector<8x128xi32>
    %c10_i32_18 = arith.constant 10 : i32
    %159 = vector.broadcast %c10_i32_18 : i32 to vector<8x128xi32>
    %160 = arith.cmpi eq, %5, %159 : vector<8x128xi32>
    %c28 = arith.constant 28 : index
    %161 = memref.load %arg2[%c28] : memref<72xi32, #tpu.memory_space<smem>>
    %162 = vector.broadcast %161 : i32 to vector<8x128xi32>
    %163 = arith.select %160, %162, %158 : vector<8x128xi1>, vector<8x128xi32>
    %c11_i32_19 = arith.constant 11 : i32
    %164 = vector.broadcast %c11_i32_19 : i32 to vector<8x128xi32>
    %165 = arith.cmpi eq, %5, %164 : vector<8x128xi32>
    %c29 = arith.constant 29 : index
    %166 = memref.load %arg2[%c29] : memref<72xi32, #tpu.memory_space<smem>>
    %167 = vector.broadcast %166 : i32 to vector<8x128xi32>
    %168 = arith.select %165, %167, %163 : vector<8x128xi1>, vector<8x128xi32>
    %c12_i32_20 = arith.constant 12 : i32
    %169 = vector.broadcast %c12_i32_20 : i32 to vector<8x128xi32>
    %170 = arith.cmpi eq, %5, %169 : vector<8x128xi32>
    %c30 = arith.constant 30 : index
    %171 = memref.load %arg2[%c30] : memref<72xi32, #tpu.memory_space<smem>>
    %172 = vector.broadcast %171 : i32 to vector<8x128xi32>
    %173 = arith.select %170, %172, %168 : vector<8x128xi1>, vector<8x128xi32>
    %c13_i32_21 = arith.constant 13 : i32
    %174 = vector.broadcast %c13_i32_21 : i32 to vector<8x128xi32>
    %175 = arith.cmpi eq, %5, %174 : vector<8x128xi32>
    %c31 = arith.constant 31 : index
    %176 = memref.load %arg2[%c31] : memref<72xi32, #tpu.memory_space<smem>>
    %177 = vector.broadcast %176 : i32 to vector<8x128xi32>
    %178 = arith.select %175, %177, %173 : vector<8x128xi1>, vector<8x128xi32>
    %c14_i32_22 = arith.constant 14 : i32
    %179 = vector.broadcast %c14_i32_22 : i32 to vector<8x128xi32>
    %180 = arith.cmpi eq, %5, %179 : vector<8x128xi32>
    %c32 = arith.constant 32 : index
    %181 = memref.load %arg2[%c32] : memref<72xi32, #tpu.memory_space<smem>>
    %182 = vector.broadcast %181 : i32 to vector<8x128xi32>
    %183 = arith.select %180, %182, %178 : vector<8x128xi1>, vector<8x128xi32>
    %c15_i32_23 = arith.constant 15 : i32
    %184 = vector.broadcast %c15_i32_23 : i32 to vector<8x128xi32>
    %185 = arith.cmpi eq, %5, %184 : vector<8x128xi32>
    %c33 = arith.constant 33 : index
    %186 = memref.load %arg2[%c33] : memref<72xi32, #tpu.memory_space<smem>>
    %187 = vector.broadcast %186 : i32 to vector<8x128xi32>
    %188 = arith.select %185, %187, %183 : vector<8x128xi1>, vector<8x128xi32>
    %c16_i32_24 = arith.constant 16 : i32
    %189 = vector.broadcast %c16_i32_24 : i32 to vector<8x128xi32>
    %190 = arith.cmpi eq, %5, %189 : vector<8x128xi32>
    %c34 = arith.constant 34 : index
    %191 = memref.load %arg2[%c34] : memref<72xi32, #tpu.memory_space<smem>>
    %192 = vector.broadcast %191 : i32 to vector<8x128xi32>
    %193 = arith.select %190, %192, %188 : vector<8x128xi1>, vector<8x128xi32>
    %c17_i32_25 = arith.constant 17 : i32
    %194 = vector.broadcast %c17_i32_25 : i32 to vector<8x128xi32>
    %195 = arith.cmpi eq, %5, %194 : vector<8x128xi32>
    %c35 = arith.constant 35 : index
    %196 = memref.load %arg2[%c35] : memref<72xi32, #tpu.memory_space<smem>>
    %197 = vector.broadcast %196 : i32 to vector<8x128xi32>
    %198 = arith.select %195, %197, %193 : vector<8x128xi1>, vector<8x128xi32>
    %c1_26 = arith.constant 1 : index
    %199 = memref.load %arg1[%c1_26] : memref<4xi32, #tpu.memory_space<smem>>
    %200 = vector.broadcast %199 : i32 to vector<8x128xi32>
    %201 = arith.cmpi slt, %5, %200 : vector<8x128xi32>
    %202 = arith.extui %201 : vector<8x128xi1> to vector<8x128xi32>
    %c0_i32_27 = arith.constant 0 : i32
    %203 = vector.broadcast %c0_i32_27 : i32 to vector<8x128xi32>
    %204 = arith.cmpi eq, %5, %203 : vector<8x128xi32>
    %c36 = arith.constant 36 : index
    %205 = memref.load %arg2[%c36] : memref<72xi32, #tpu.memory_space<smem>>
    %206 = vector.broadcast %205 : i32 to vector<8x128xi32>
    %207 = arith.select %204, %206, %14 : vector<8x128xi1>, vector<8x128xi32>
    %c1_i32_28 = arith.constant 1 : i32
    %208 = vector.broadcast %c1_i32_28 : i32 to vector<8x128xi32>
    %209 = arith.cmpi eq, %5, %208 : vector<8x128xi32>
    %c37 = arith.constant 37 : index
    %210 = memref.load %arg2[%c37] : memref<72xi32, #tpu.memory_space<smem>>
    %211 = vector.broadcast %210 : i32 to vector<8x128xi32>
    %212 = arith.select %209, %211, %207 : vector<8x128xi1>, vector<8x128xi32>
    %c2_i32_29 = arith.constant 2 : i32
    %213 = vector.broadcast %c2_i32_29 : i32 to vector<8x128xi32>
    %214 = arith.cmpi eq, %5, %213 : vector<8x128xi32>
    %c38 = arith.constant 38 : index
    %215 = memref.load %arg2[%c38] : memref<72xi32, #tpu.memory_space<smem>>
    %216 = vector.broadcast %215 : i32 to vector<8x128xi32>
    %217 = arith.select %214, %216, %212 : vector<8x128xi1>, vector<8x128xi32>
    %c3_i32_30 = arith.constant 3 : i32
    %218 = vector.broadcast %c3_i32_30 : i32 to vector<8x128xi32>
    %219 = arith.cmpi eq, %5, %218 : vector<8x128xi32>
    %c39 = arith.constant 39 : index
    %220 = memref.load %arg2[%c39] : memref<72xi32, #tpu.memory_space<smem>>
    %221 = vector.broadcast %220 : i32 to vector<8x128xi32>
    %222 = arith.select %219, %221, %217 : vector<8x128xi1>, vector<8x128xi32>
    %c4_i32_31 = arith.constant 4 : i32
    %223 = vector.broadcast %c4_i32_31 : i32 to vector<8x128xi32>
    %224 = arith.cmpi eq, %5, %223 : vector<8x128xi32>
    %c40 = arith.constant 40 : index
    %225 = memref.load %arg2[%c40] : memref<72xi32, #tpu.memory_space<smem>>
    %226 = vector.broadcast %225 : i32 to vector<8x128xi32>
    %227 = arith.select %224, %226, %222 : vector<8x128xi1>, vector<8x128xi32>
    %c5_i32_32 = arith.constant 5 : i32
    %228 = vector.broadcast %c5_i32_32 : i32 to vector<8x128xi32>
    %229 = arith.cmpi eq, %5, %228 : vector<8x128xi32>
    %c41 = arith.constant 41 : index
    %230 = memref.load %arg2[%c41] : memref<72xi32, #tpu.memory_space<smem>>
    %231 = vector.broadcast %230 : i32 to vector<8x128xi32>
    %232 = arith.select %229, %231, %227 : vector<8x128xi1>, vector<8x128xi32>
    %c6_i32_33 = arith.constant 6 : i32
    %233 = vector.broadcast %c6_i32_33 : i32 to vector<8x128xi32>
    %234 = arith.cmpi eq, %5, %233 : vector<8x128xi32>
    %c42 = arith.constant 42 : index
    %235 = memref.load %arg2[%c42] : memref<72xi32, #tpu.memory_space<smem>>
    %236 = vector.broadcast %235 : i32 to vector<8x128xi32>
    %237 = arith.select %234, %236, %232 : vector<8x128xi1>, vector<8x128xi32>
    %c7_i32_34 = arith.constant 7 : i32
    %238 = vector.broadcast %c7_i32_34 : i32 to vector<8x128xi32>
    %239 = arith.cmpi eq, %5, %238 : vector<8x128xi32>
    %c43 = arith.constant 43 : index
    %240 = memref.load %arg2[%c43] : memref<72xi32, #tpu.memory_space<smem>>
    %241 = vector.broadcast %240 : i32 to vector<8x128xi32>
    %242 = arith.select %239, %241, %237 : vector<8x128xi1>, vector<8x128xi32>
    %c8_i32_35 = arith.constant 8 : i32
    %243 = vector.broadcast %c8_i32_35 : i32 to vector<8x128xi32>
    %244 = arith.cmpi eq, %5, %243 : vector<8x128xi32>
    %c44 = arith.constant 44 : index
    %245 = memref.load %arg2[%c44] : memref<72xi32, #tpu.memory_space<smem>>
    %246 = vector.broadcast %245 : i32 to vector<8x128xi32>
    %247 = arith.select %244, %246, %242 : vector<8x128xi1>, vector<8x128xi32>
    %c9_i32_36 = arith.constant 9 : i32
    %248 = vector.broadcast %c9_i32_36 : i32 to vector<8x128xi32>
    %249 = arith.cmpi eq, %5, %248 : vector<8x128xi32>
    %c45 = arith.constant 45 : index
    %250 = memref.load %arg2[%c45] : memref<72xi32, #tpu.memory_space<smem>>
    %251 = vector.broadcast %250 : i32 to vector<8x128xi32>
    %252 = arith.select %249, %251, %247 : vector<8x128xi1>, vector<8x128xi32>
    %c10_i32_37 = arith.constant 10 : i32
    %253 = vector.broadcast %c10_i32_37 : i32 to vector<8x128xi32>
    %254 = arith.cmpi eq, %5, %253 : vector<8x128xi32>
    %c46 = arith.constant 46 : index
    %255 = memref.load %arg2[%c46] : memref<72xi32, #tpu.memory_space<smem>>
    %256 = vector.broadcast %255 : i32 to vector<8x128xi32>
    %257 = arith.select %254, %256, %252 : vector<8x128xi1>, vector<8x128xi32>
    %c11_i32_38 = arith.constant 11 : i32
    %258 = vector.broadcast %c11_i32_38 : i32 to vector<8x128xi32>
    %259 = arith.cmpi eq, %5, %258 : vector<8x128xi32>
    %c47 = arith.constant 47 : index
    %260 = memref.load %arg2[%c47] : memref<72xi32, #tpu.memory_space<smem>>
    %261 = vector.broadcast %260 : i32 to vector<8x128xi32>
    %262 = arith.select %259, %261, %257 : vector<8x128xi1>, vector<8x128xi32>
    %c12_i32_39 = arith.constant 12 : i32
    %263 = vector.broadcast %c12_i32_39 : i32 to vector<8x128xi32>
    %264 = arith.cmpi eq, %5, %263 : vector<8x128xi32>
    %c48 = arith.constant 48 : index
    %265 = memref.load %arg2[%c48] : memref<72xi32, #tpu.memory_space<smem>>
    %266 = vector.broadcast %265 : i32 to vector<8x128xi32>
    %267 = arith.select %264, %266, %262 : vector<8x128xi1>, vector<8x128xi32>
    %c13_i32_40 = arith.constant 13 : i32
    %268 = vector.broadcast %c13_i32_40 : i32 to vector<8x128xi32>
    %269 = arith.cmpi eq, %5, %268 : vector<8x128xi32>
    %c49 = arith.constant 49 : index
    %270 = memref.load %arg2[%c49] : memref<72xi32, #tpu.memory_space<smem>>
    %271 = vector.broadcast %270 : i32 to vector<8x128xi32>
    %272 = arith.select %269, %271, %267 : vector<8x128xi1>, vector<8x128xi32>
    %c14_i32_41 = arith.constant 14 : i32
    %273 = vector.broadcast %c14_i32_41 : i32 to vector<8x128xi32>
    %274 = arith.cmpi eq, %5, %273 : vector<8x128xi32>
    %c50 = arith.constant 50 : index
    %275 = memref.load %arg2[%c50] : memref<72xi32, #tpu.memory_space<smem>>
    %276 = vector.broadcast %275 : i32 to vector<8x128xi32>
    %277 = arith.select %274, %276, %272 : vector<8x128xi1>, vector<8x128xi32>
    %c15_i32_42 = arith.constant 15 : i32
    %278 = vector.broadcast %c15_i32_42 : i32 to vector<8x128xi32>
    %279 = arith.cmpi eq, %5, %278 : vector<8x128xi32>
    %c51 = arith.constant 51 : index
    %280 = memref.load %arg2[%c51] : memref<72xi32, #tpu.memory_space<smem>>
    %281 = vector.broadcast %280 : i32 to vector<8x128xi32>
    %282 = arith.select %279, %281, %277 : vector<8x128xi1>, vector<8x128xi32>
    %c16_i32_43 = arith.constant 16 : i32
    %283 = vector.broadcast %c16_i32_43 : i32 to vector<8x128xi32>
    %284 = arith.cmpi eq, %5, %283 : vector<8x128xi32>
    %c52 = arith.constant 52 : index
    %285 = memref.load %arg2[%c52] : memref<72xi32, #tpu.memory_space<smem>>
    %286 = vector.broadcast %285 : i32 to vector<8x128xi32>
    %287 = arith.select %284, %286, %282 : vector<8x128xi1>, vector<8x128xi32>
    %c17_i32_44 = arith.constant 17 : i32
    %288 = vector.broadcast %c17_i32_44 : i32 to vector<8x128xi32>
    %289 = arith.cmpi eq, %5, %288 : vector<8x128xi32>
    %c53 = arith.constant 53 : index
    %290 = memref.load %arg2[%c53] : memref<72xi32, #tpu.memory_space<smem>>
    %291 = vector.broadcast %290 : i32 to vector<8x128xi32>
    %292 = arith.select %289, %291, %287 : vector<8x128xi1>, vector<8x128xi32>
    %c2_45 = arith.constant 2 : index
    %293 = memref.load %arg1[%c2_45] : memref<4xi32, #tpu.memory_space<smem>>
    %294 = vector.broadcast %293 : i32 to vector<8x128xi32>
    %295 = arith.cmpi slt, %5, %294 : vector<8x128xi32>
    %296 = arith.extui %295 : vector<8x128xi1> to vector<8x128xi32>
    %c0_i32_46 = arith.constant 0 : i32
    %297 = vector.broadcast %c0_i32_46 : i32 to vector<8x128xi32>
    %298 = arith.cmpi eq, %5, %297 : vector<8x128xi32>
    %c54 = arith.constant 54 : index
    %299 = memref.load %arg2[%c54] : memref<72xi32, #tpu.memory_space<smem>>
    %300 = vector.broadcast %299 : i32 to vector<8x128xi32>
    %301 = arith.select %298, %300, %14 : vector<8x128xi1>, vector<8x128xi32>
    %c1_i32_47 = arith.constant 1 : i32
    %302 = vector.broadcast %c1_i32_47 : i32 to vector<8x128xi32>
    %303 = arith.cmpi eq, %5, %302 : vector<8x128xi32>
    %c55 = arith.constant 55 : index
    %304 = memref.load %arg2[%c55] : memref<72xi32, #tpu.memory_space<smem>>
    %305 = vector.broadcast %304 : i32 to vector<8x128xi32>
    %306 = arith.select %303, %305, %301 : vector<8x128xi1>, vector<8x128xi32>
    %c2_i32_48 = arith.constant 2 : i32
    %307 = vector.broadcast %c2_i32_48 : i32 to vector<8x128xi32>
    %308 = arith.cmpi eq, %5, %307 : vector<8x128xi32>
    %c56 = arith.constant 56 : index
    %309 = memref.load %arg2[%c56] : memref<72xi32, #tpu.memory_space<smem>>
    %310 = vector.broadcast %309 : i32 to vector<8x128xi32>
    %311 = arith.select %308, %310, %306 : vector<8x128xi1>, vector<8x128xi32>
    %c3_i32_49 = arith.constant 3 : i32
    %312 = vector.broadcast %c3_i32_49 : i32 to vector<8x128xi32>
    %313 = arith.cmpi eq, %5, %312 : vector<8x128xi32>
    %c57 = arith.constant 57 : index
    %314 = memref.load %arg2[%c57] : memref<72xi32, #tpu.memory_space<smem>>
    %315 = vector.broadcast %314 : i32 to vector<8x128xi32>
    %316 = arith.select %313, %315, %311 : vector<8x128xi1>, vector<8x128xi32>
    %c4_i32_50 = arith.constant 4 : i32
    %317 = vector.broadcast %c4_i32_50 : i32 to vector<8x128xi32>
    %318 = arith.cmpi eq, %5, %317 : vector<8x128xi32>
    %c58 = arith.constant 58 : index
    %319 = memref.load %arg2[%c58] : memref<72xi32, #tpu.memory_space<smem>>
    %320 = vector.broadcast %319 : i32 to vector<8x128xi32>
    %321 = arith.select %318, %320, %316 : vector<8x128xi1>, vector<8x128xi32>
    %c5_i32_51 = arith.constant 5 : i32
    %322 = vector.broadcast %c5_i32_51 : i32 to vector<8x128xi32>
    %323 = arith.cmpi eq, %5, %322 : vector<8x128xi32>
    %c59 = arith.constant 59 : index
    %324 = memref.load %arg2[%c59] : memref<72xi32, #tpu.memory_space<smem>>
    %325 = vector.broadcast %324 : i32 to vector<8x128xi32>
    %326 = arith.select %323, %325, %321 : vector<8x128xi1>, vector<8x128xi32>
    %c6_i32_52 = arith.constant 6 : i32
    %327 = vector.broadcast %c6_i32_52 : i32 to vector<8x128xi32>
    %328 = arith.cmpi eq, %5, %327 : vector<8x128xi32>
    %c60 = arith.constant 60 : index
    %329 = memref.load %arg2[%c60] : memref<72xi32, #tpu.memory_space<smem>>
    %330 = vector.broadcast %329 : i32 to vector<8x128xi32>
    %331 = arith.select %328, %330, %326 : vector<8x128xi1>, vector<8x128xi32>
    %c7_i32_53 = arith.constant 7 : i32
    %332 = vector.broadcast %c7_i32_53 : i32 to vector<8x128xi32>
    %333 = arith.cmpi eq, %5, %332 : vector<8x128xi32>
    %c61 = arith.constant 61 : index
    %334 = memref.load %arg2[%c61] : memref<72xi32, #tpu.memory_space<smem>>
    %335 = vector.broadcast %334 : i32 to vector<8x128xi32>
    %336 = arith.select %333, %335, %331 : vector<8x128xi1>, vector<8x128xi32>
    %c8_i32_54 = arith.constant 8 : i32
    %337 = vector.broadcast %c8_i32_54 : i32 to vector<8x128xi32>
    %338 = arith.cmpi eq, %5, %337 : vector<8x128xi32>
    %c62 = arith.constant 62 : index
    %339 = memref.load %arg2[%c62] : memref<72xi32, #tpu.memory_space<smem>>
    %340 = vector.broadcast %339 : i32 to vector<8x128xi32>
    %341 = arith.select %338, %340, %336 : vector<8x128xi1>, vector<8x128xi32>
    %c9_i32_55 = arith.constant 9 : i32
    %342 = vector.broadcast %c9_i32_55 : i32 to vector<8x128xi32>
    %343 = arith.cmpi eq, %5, %342 : vector<8x128xi32>
    %c63 = arith.constant 63 : index
    %344 = memref.load %arg2[%c63] : memref<72xi32, #tpu.memory_space<smem>>
    %345 = vector.broadcast %344 : i32 to vector<8x128xi32>
    %346 = arith.select %343, %345, %341 : vector<8x128xi1>, vector<8x128xi32>
    %c10_i32_56 = arith.constant 10 : i32
    %347 = vector.broadcast %c10_i32_56 : i32 to vector<8x128xi32>
    %348 = arith.cmpi eq, %5, %347 : vector<8x128xi32>
    %c64 = arith.constant 64 : index
    %349 = memref.load %arg2[%c64] : memref<72xi32, #tpu.memory_space<smem>>
    %350 = vector.broadcast %349 : i32 to vector<8x128xi32>
    %351 = arith.select %348, %350, %346 : vector<8x128xi1>, vector<8x128xi32>
    %c11_i32_57 = arith.constant 11 : i32
    %352 = vector.broadcast %c11_i32_57 : i32 to vector<8x128xi32>
    %353 = arith.cmpi eq, %5, %352 : vector<8x128xi32>
    %c65 = arith.constant 65 : index
    %354 = memref.load %arg2[%c65] : memref<72xi32, #tpu.memory_space<smem>>
    %355 = vector.broadcast %354 : i32 to vector<8x128xi32>
    %356 = arith.select %353, %355, %351 : vector<8x128xi1>, vector<8x128xi32>
    %c12_i32_58 = arith.constant 12 : i32
    %357 = vector.broadcast %c12_i32_58 : i32 to vector<8x128xi32>
    %358 = arith.cmpi eq, %5, %357 : vector<8x128xi32>
    %c66 = arith.constant 66 : index
    %359 = memref.load %arg2[%c66] : memref<72xi32, #tpu.memory_space<smem>>
    %360 = vector.broadcast %359 : i32 to vector<8x128xi32>
    %361 = arith.select %358, %360, %356 : vector<8x128xi1>, vector<8x128xi32>
    %c13_i32_59 = arith.constant 13 : i32
    %362 = vector.broadcast %c13_i32_59 : i32 to vector<8x128xi32>
    %363 = arith.cmpi eq, %5, %362 : vector<8x128xi32>
    %c67 = arith.constant 67 : index
    %364 = memref.load %arg2[%c67] : memref<72xi32, #tpu.memory_space<smem>>
    %365 = vector.broadcast %364 : i32 to vector<8x128xi32>
    %366 = arith.select %363, %365, %361 : vector<8x128xi1>, vector<8x128xi32>
    %c14_i32_60 = arith.constant 14 : i32
    %367 = vector.broadcast %c14_i32_60 : i32 to vector<8x128xi32>
    %368 = arith.cmpi eq, %5, %367 : vector<8x128xi32>
    %c68 = arith.constant 68 : index
    %369 = memref.load %arg2[%c68] : memref<72xi32, #tpu.memory_space<smem>>
    %370 = vector.broadcast %369 : i32 to vector<8x128xi32>
    %371 = arith.select %368, %370, %366 : vector<8x128xi1>, vector<8x128xi32>
    %c15_i32_61 = arith.constant 15 : i32
    %372 = vector.broadcast %c15_i32_61 : i32 to vector<8x128xi32>
    %373 = arith.cmpi eq, %5, %372 : vector<8x128xi32>
    %c69 = arith.constant 69 : index
    %374 = memref.load %arg2[%c69] : memref<72xi32, #tpu.memory_space<smem>>
    %375 = vector.broadcast %374 : i32 to vector<8x128xi32>
    %376 = arith.select %373, %375, %371 : vector<8x128xi1>, vector<8x128xi32>
    %c16_i32_62 = arith.constant 16 : i32
    %377 = vector.broadcast %c16_i32_62 : i32 to vector<8x128xi32>
    %378 = arith.cmpi eq, %5, %377 : vector<8x128xi32>
    %c70 = arith.constant 70 : index
    %379 = memref.load %arg2[%c70] : memref<72xi32, #tpu.memory_space<smem>>
    %380 = vector.broadcast %379 : i32 to vector<8x128xi32>
    %381 = arith.select %378, %380, %376 : vector<8x128xi1>, vector<8x128xi32>
    %c17_i32_63 = arith.constant 17 : i32
    %382 = vector.broadcast %c17_i32_63 : i32 to vector<8x128xi32>
    %383 = arith.cmpi eq, %5, %382 : vector<8x128xi32>
    %c71 = arith.constant 71 : index
    %384 = memref.load %arg2[%c71] : memref<72xi32, #tpu.memory_space<smem>>
    %385 = vector.broadcast %384 : i32 to vector<8x128xi32>
    %386 = arith.select %383, %385, %381 : vector<8x128xi1>, vector<8x128xi32>
    %c3_64 = arith.constant 3 : index
    %387 = memref.load %arg1[%c3_64] : memref<4xi32, #tpu.memory_space<smem>>
    %388 = vector.broadcast %387 : i32 to vector<8x128xi32>
    %389 = arith.cmpi slt, %5, %388 : vector<8x128xi32>
    %390 = arith.extui %389 : vector<8x128xi1> to vector<8x128xi32>
    %391 = tpu.concatenate %104, %198, %292, %386 in 1 : vector<8x128xi32>, vector<8x128xi32>, vector<8x128xi32>, vector<8x128xi32> -> vector<8x512xi32>
    %c0_65 = arith.constant 0 : index
    %c0_66 = arith.constant 0 : index
    %392 = vector.load %arg5[%c0_65, %c0_66] : memref<8x512xi32, #tpu.memory_space<vmem>>, vector<8x512xi32>
    tpu.vector_store %arg5[%c0_65, %c0_66], %391 {strides = array<i32>} : memref<8x512xi32, #tpu.memory_space<vmem>>, vector<8x512xi32>,
    %393 = tpu.concatenate %108, %202, %296, %390 in 1 : vector<8x128xi32>, vector<8x128xi32>, vector<8x128xi32>, vector<8x128xi32> -> vector<8x512xi32>
    %c0_67 = arith.constant 0 : index
    %c0_68 = arith.constant 0 : index
    %394 = vector.load %arg6[%c0_67, %c0_68] : memref<8x512xi32, #tpu.memory_space<vmem>>, vector<8x512xi32>
    tpu.vector_store %arg6[%c0_67, %c0_68], %393 {strides = array<i32>} : memref<8x512xi32, #tpu.memory_space<vmem>>, vector<8x512xi32>,
    return
  }
  func.func @transform_0(%arg0: i32, %arg1: memref<4xi32, #tpu.memory_space<smem>>, %arg2: memref<72xi32, #tpu.memory_space<smem>>) -> (i32, i32) {
    %c0_i32 = arith.constant 0 : i32
    %c0_i32_0 = arith.constant 0 : i32
    return %arg0, %c0_i32 : i32, i32
  }
  func.func @transform_1(%arg0: i32, %arg1: memref<4xi32, #tpu.memory_space<smem>>, %arg2: memref<72xi32, #tpu.memory_space<smem>>) -> (i32, i32) {
    %c0_i32 = arith.constant 0 : i32
    %c0_i32_0 = arith.constant 0 : i32
    return %arg0, %c0_i32 : i32, i32
  }
  func.func @transform_2(%arg0: i32, %arg1: memref<4xi32, #tpu.memory_space<smem>>, %arg2: memref<72xi32, #tpu.memory_space<smem>>) -> (i32, i32) {
    %c0_i32 = arith.constant 0 : i32
    %c0_i32_0 = arith.constant 0 : i32
    return %arg0, %c0_i32 : i32, i32
  }
  func.func @transform_3(%arg0: i32, %arg1: memref<4xi32, #tpu.memory_space<smem>>, %arg2: memref<72xi32, #tpu.memory_space<smem>>) -> (i32, i32) {
    %c0_i32 = arith.constant 0 : i32
    %c0_i32_0 = arith.constant 0 : i32
    return %arg0, %c0_i32 : i32, i32
  }
}

</mosaic_0001>

<bundles_post_ra>
// kernel: tpu_custom_call.1
= control target key start
LH: loop header
LB: loop body
LE: loop exit
PB: predicated region body
PF: predicated region fallthrough
CT: control target
= control target key end

     0   :  { %s1080_s0 = inlined_call_operand.vmem [shape: s32[4], index: 0, kind: input, shape index: {}]   ;;  %s1081_s2 = inlined_call_operand.vmem [shape: s32[8,1], index: 2, kind: input, shape index: {}]   ;;  %s1082_s3 = inlined_call_operand.vmem [shape: s32[8,128], index: 3, kind: input, shape index: {}]   ;;  %s1083_s4 = inlined_call_operand.hbm [shape: s32[8,512], index: 4, kind: output, shape index: {0}]   ;;  %s1084_s5 = inlined_call_operand.hbm [shape: s32[8,512], index: 5, kind: output, shape index: {1}]   ;;  %s1085_s1 = inlined_call_operand.vmem [shape: s32[72], index: 1, kind: input, shape index: {}]  }
   0x1   :  { %1162 = sst [smem:[#allocation80_spill]] %s1082_s3  ;;  %s11_s20 = sshll.u32 %s1080_s0, 4  ;;  %s12_s20 = int_to_ptr.vmem [resolvable:$true] %s11_s20 }
   0x2   :  { %1163 = sst [smem:[#allocation81_spill]] %s1083_s4  ;;  %s15_s23 = sshll.u32 %s1085_s1, 4  ;;  %s16_s23 = int_to_ptr.vmem [resolvable:$true] %s15_s23 }
   0x3   :  { %1164 = sst [smem:[#allocation82_spill]] %s1084_s5  ;;  %s407_s24 = scalar_lea.vmem %s12_s20, 16 }
   0x4   :  { %p408_p0 = scmp.ne.s32.totalorder %s12_s20, %s407_s24  ;;  %p412_p1 = scmp.lt.s32.totalorder %s12_s20, %s12_s20 }
   0x5   :  { %p413_p2 = scmp.lt.s32.totalorder %s407_s24, %s407_s24 }
   0x7   :  { %p414_p3 = por %p413_p2, %p412_p1 }
   0x9   :  { %p415_p4 = pnand %p414_p3, %p408_p0 }
   0xb   :  { %418 = shalt.err (!%p415_p4)  }
   0xc   :  { %s477_s25 = smov [#allocation3]   ;;  %s419_s26 = scalar_lea.vmem %s16_s23, 16 }
   0xd   :  { %14 = dma.vmem_to_smem %s12_s20, 16, %s477_s25, [#allocation2] }
   0xe   :  { %p420_p5 = scmp.ne.s32.totalorder %s16_s23, %s419_s26  ;;  %p424_p6 = scmp.lt.s32.totalorder %s16_s23, %s16_s23 }
   0xf   :  { %p425_p7 = scmp.lt.s32.totalorder %s419_s26, %s419_s26 }
  0x11   :  { %p426_p8 = por %p425_p7, %p424_p6 }
  0x13   :  { %p427_p9 = pnand %p426_p8, %p420_p5 }
  0x15   :  { %430 = shalt.err (!%p427_p9)  }
  0x16   :  { %s478_s0 = smov [#allocation4]  }
  0x17   :  { %18 = dma.vmem_to_smem %s16_s23, 16, %s478_s0, [#allocation2] }
  0x18   :  { %471 = dma.done.wait [#allocation2], 32 }
  0x19   :  { %472 = vsyncadd [#allocation2], 4294967264 }
  0x1a   :  { %20 = sfence }
  0x1b   :  { %21 = vsyncpa [#allocation6], 0  ;;  %v29_v0 = vld [vmem:[%s1081_s2] sm:$0xff]  ;;  %v1149_v1 = vmov 0  }
  0x1c   :  { %406 = vset.pattern.permute.xlu0 %v1149_v1 }
  0x1d   :  { %22 = vsyncpa [#allocation8], 0  ;;  %31 = vperm.xlu0 %406, %v29_v0   ;;  %s522_s28 = sld [smem:[#allocation4]]  ;;  %v27_v2 = vlaneseq }
  0x1e   :  { %s524_s29 = sld [smem:[#allocation4 + $0x1]] }
  0x1f   :  { %s526_s30 = sld [smem:[#allocation4 + $0x2]]  ;;  %v648_v3 = vand.u32 127, %v27_v2 }
  0x20   :  { %s528_s6 = sld [smem:[#allocation4 + $0x3]] }
  0x21   :  { %s530_s7 = sld [smem:[#allocation4 + $0x4]] }
  0x22   :  { %s532_s8 = sld [smem:[#allocation4 + $0x5]] }
  0x23   :  { %1165 = sst [smem:[#allocation12_spill]] %s522_s28  ;;  %v42_v4 = vstv %s522_s28 }
  0x24   :  { %1166 = sst [smem:[#allocation13_spill]] %s524_s29  ;;  %v46_v5 = vstv %s524_s29 }
  0x25   :  { %1167 = sst [smem:[#allocation14_spill]] %s526_s30  ;;  %v50_v6 = vstv %s526_s30 }
  0x26   :  { %1168 = sst [smem:[#allocation15_spill]] %s528_s6  ;;  %v54_v7 = vstv %s528_s6 }
  0x27   :  { %1169 = sst [smem:[#allocation16_spill]] %s530_s7  ;;  %v58_v8 = vstv %s530_s7 }
  0x28   :  { %1170 = sst [smem:[#allocation17_spill]] %s532_s8  ;;  %v62_v9 = vstv %s532_s8 }
  0x29   :  { %s534_s9 = sld [smem:[#allocation4 + $0x6]] }
  0x2a   :  { %s536_s2 = sld [smem:[#allocation4 + $0x7]] }
  0x2b   :  { %s538_s10 = sld [smem:[#allocation4 + $0x8]] }
  0x2c   :  { %s540_s11 = sld [smem:[#allocation4 + $0x12]] }
  0x2d   :  { %s542_s12 = sld [smem:[#allocation4 + $0x13]] }
  0x2e   :  { %s544_s13 = sld [smem:[#allocation4 + $0x14]] }
  0x2f   :  { %1171 = sst [smem:[#allocation18_spill]] %s534_s9  ;;  %v66_v10 = vstv %s534_s9 }
  0x30   :  { %1172 = sst [smem:[#allocation19_spill]] %s536_s2  ;;  %v70_v11 = vstv %s536_s2 }
  0x31   :  { %1173 = sst [smem:[#allocation20_spill]] %s538_s10  ;;  %v74_v12 = vstv %s538_s10 }
  0x32   :  { %1174 = sst [smem:[#allocation21_spill]] %s540_s11  ;;  %v117_v13 = vstv %s540_s11 }
  0x33   :  { %1175 = sst [smem:[#allocation22_spill]] %s542_s12  ;;  %v120_v14 = vstv %s542_s12 }
  0x34   :  { %1176 = sst [smem:[#allocation23_spill]] %s544_s13  ;;  %v123_v15 = vstv %s544_s13 }
  0x35   :  { %s546_s14 = sld [smem:[#allocation4 + $0x15]] }
  0x36   :  { %s548_s15 = sld [smem:[#allocation4 + $0x16]] }
  0x37   :  { %s550_s16 = sld [smem:[#allocation4 + $0x17]] }
  0x38   :  { %s552_s17 = sld [smem:[#allocation4 + $0x18]] }
  0x39   :  { %s554_s18 = sld [smem:[#allocation4 + $0x19]] }
  0x3a   :  { %s556_s19 = sld [smem:[#allocation4 + $0x1a]] }
  0x3b   :  { %1177 = sst [smem:[#allocation24_spill]] %s546_s14  ;;  %v126_v16 = vstv %s546_s14 }
  0x3c   :  { %1178 = sst [smem:[#allocation25_spill]] %s548_s15  ;;  %v129_v17 = vstv %s548_s15 }
  0x3d   :  { %1179 = sst [smem:[#allocation26_spill]] %s550_s16  ;;  %v132_v18 = vstv %s550_s16 }
  0x3e   :  { %1180 = sst [smem:[#allocation27_spill]] %s552_s17  ;;  %v135_v19 = vstv %s552_s17 }
  0x3f   :  { %1181 = sst [smem:[#allocation28_spill]] %s554_s18  ;;  %v138_v20 = vstv %s554_s18 }
  0x40   :  { %1182 = sst [smem:[#allocation29_spill]] %s556_s19  ;;  %v141_v21 = vstv %s556_s19 }
  0x41   :  { %s558_s20 = sld [smem:[#allocation4 + $0x24]] }
  0x42   :  { %s560_s21 = sld [smem:[#allocation4 + $0x25]] }
  0x43   :  { %s562_s22 = sld [smem:[#allocation4 + $0x26]] }
  0x44   :  { %s564_s23 = sld [smem:[#allocation4 + $0x27]] }
  0x45   :  { %s566_s24 = sld [smem:[#allocation4 + $0x28]] }
  0x46   :  { %s568_s25 = sld [smem:[#allocation4 + $0x29]] }
  0x47   :  { %1183 = sst [smem:[#allocation30_spill]] %s558_s20  ;;  %v175_v22 = vstv %s558_s20 }
  0x48   :  { %1184 = sst [smem:[#allocation31_spill]] %s560_s21  ;;  %v178_v23 = vstv %s560_s21 }
  0x49   :  { %1185 = sst [smem:[#allocation32_spill]] %s562_s22 }
  0x4a   :  { %1186 = sst [smem:[#allocation33_spill]] %s564_s23 }
  0x4b   :  { %1187 = sst [smem:[#allocation34_spill]] %s566_s24 }
  0x4c   :  { %1188 = sst [smem:[#allocation35_spill]] %s568_s25 }
  0x4d   :  { %s570_s26 = sld [smem:[#allocation4 + $0x2a]] }
  0x4e   :  { %s572_s0 = sld [smem:[#allocation4 + $0x2b]] }
  0x4f   :  { %s574_s1 = sld [smem:[#allocation4 + $0x2c]] }
  0x50   :  { %s576_s27 = sld [smem:[#allocation4 + $0x36]] }
  0x51   :  { %s578_s5 = sld [smem:[#allocation4 + $0x37]] }
  0x52   :  { %s580_s4 = sld [smem:[#allocation4 + $0x38]] }
  0x53   :  { %1189 = sst [smem:[#allocation36_spill]] %s570_s26 }
  0x54   :  { %1190 = sst [smem:[#allocation37_spill]] %s572_s0 }
  0x55   :  { %1191 = sst [smem:[#allocation38_spill]] %s574_s1 }
  0x56   :  { %1192 = sst [smem:[#allocation39_spill]] %s576_s27 }
  0x57   :  { %1193 = sst [smem:[#allocation40_spill]] %s578_s5 }
  0x58   :  { %1194 = sst [smem:[#allocation41_spill]] %s580_s4 }
  0x59   :  { %s582_s3 = sld [smem:[#allocation4 + $0x39]] }
  0x5a   :  { %s584_s22 = sld [smem:[#allocation4 + $0x3a]] }
  0x5b   :  { %s586_s23 = sld [smem:[#allocation4 + $0x3b]] }
  0x5c   :  { %s588_s24 = sld [smem:[#allocation4 + $0x3c]] }
  0x5d   :  { %s590_s25 = sld [smem:[#allocation4 + $0x3d]] }
  0x5e   :  { %s592_s26 = sld [smem:[#allocation4 + $0x3e]] }
  0x5f   :  { %1195 = sst [smem:[#allocation42_spill]] %s582_s3 }
  0x60   :  { %1196 = sst [smem:[#allocation43_spill]] %s584_s22 }
  0x61   :  { %1197 = sst [smem:[#allocation44_spill]] %s586_s23 }
  0x62   :  { %1198 = sst [smem:[#allocation45_spill]] %s588_s24 }
  0x63   :  { %1199 = sst [smem:[#allocation46_spill]] %s590_s25 }
  0x64   :  { %1200 = sst [smem:[#allocation47_spill]] %s592_s26 }
  0x65   :  { %s594_s0 = sld [smem:[#allocation4 + $0x9]] }
  0x66   :  { %s596_s1 = sld [smem:[#allocation4 + $0xa]] }
  0x67   :  { %s598_s27 = sld [smem:[#allocation4 + $0xb]] }
  0x68   :  { %s600_s5 = sld [smem:[#allocation4 + $0xc]] }
  0x69   :  { %s602_s4 = sld [smem:[#allocation4 + $0xd]] }
  0x6a   :  { %s604_s3 = sld [smem:[#allocation4 + $0xe]] }
  0x6b   :  { %1201 = sst [smem:[#allocation48_spill]] %s594_s0 }
  0x6c   :  { %1202 = sst [smem:[#allocation49_spill]] %s596_s1 }
  0x6d   :  { %1203 = sst [smem:[#allocation50_spill]] %s598_s27 }
  0x6e   :  { %1204 = sst [smem:[#allocation51_spill]] %s600_s5 }
  0x6f   :  { %1205 = sst [smem:[#allocation52_spill]] %s602_s4  ;;  %v94_v44 = vstv %s602_s4 }
  0x70   :  { %1206 = sst [smem:[#allocation53_spill]] %s604_s3 }
  0x71   :  { %s606_s22 = sld [smem:[#allocation4 + $0xf]] }
  0x72   :  { %s608_s23 = sld [smem:[#allocation4 + $0x10]] }
  0x73   :  { %s610_s24 = sld [smem:[#allocation4 + $0x11]] }
  0x74   :  { %s612_s25 = sld [smem:[#allocation4 + $0x1b]] }
  0x75   :  { %s614_s26 = sld [smem:[#allocation4 + $0x1c]] }
  0x76   :  { %s616_s0 = sld [smem:[#allocation4 + $0x1d]] }
  0x77   :  { %1207 = sst [smem:[#allocation54_spill]] %s606_s22 }
  0x78   :  { %1208 = sst [smem:[#allocation55_spill]] %s608_s23 }
  0x79   :  { %1209 = sst [smem:[#allocation56_spill]] %s610_s24 }
  0x7a   :  { %1210 = sst [smem:[#allocation57_spill]] %s612_s25 }
  0x7b   :  { %1211 = sst [smem:[#allocation58_spill]] %s614_s26 }
  0x7c   :  { %s618_s1 = sld [smem:[#allocation4 + $0x1e]]  ;;  %v150_v51 = vstv %s616_s0 }
  0x7d   :  { %s620_s27 = sld [smem:[#allocation4 + $0x1f]] }
  0x7e   :  { %s622_s5 = sld [smem:[#allocation4 + $0x20]] }
  0x7f   :  { %s624_s3 = sld [smem:[#allocation4 + $0x21]] }
  0x80   :  { %s626_s22 = sld [smem:[#allocation4 + $0x22]] }
  0x81   :  { %s628_s24 = sld [smem:[#allocation4 + $0x23]] }
  0x82   :  { %1212 = sst [smem:[#allocation59_spill]] %s618_s1 }
  0x83   :  { %1213 = sst [smem:[#allocation60_spill]] %s620_s27 }
  0x84   :  { %1214 = sst [smem:[#allocation61_spill]] %s622_s5 }
  0x85   :  { %1215 = sst [smem:[#allocation62_spill]] %s624_s3 }
  0x86   :  { %1216 = sst [smem:[#allocation63_spill]] %s626_s22 }
  0x87   :  { %1217 = sst [smem:[#allocation64_spill]] %s628_s24 }
  0x88   :  { %s630_s25 = sld [smem:[#allocation4 + $0x2d]] }
  0x89   :  { %s632_s26 = sld [smem:[#allocation4 + $0x2e]] }
  0x8a   :  { %s634_s1 = sld [smem:[#allocation4 + $0x2f]] }
  0x8b   :  { %s636_s27 = sld [smem:[#allocation4 + $0x30]] }
  0x8c   :  { %s638_s5 = sld [smem:[#allocation4 + $0x31]] }
  0x8d   :  { %s640_s22 = sld [smem:[#allocation4 + $0x32]] }
  0x8e   :  { %1218 = sst [smem:[#allocation65_spill]] %s630_s25 }
  0x8f   :  { %1219 = sst [smem:[#allocation66_spill]] %s632_s26 }
  0x90   :  { %s642_s24 = sld [smem:[#allocation4 + $0x33]] }
  0x91   :  { %1220 = sst [smem:[#allocation67_spill]] %s636_s27 }
  0x92   :  { %1221 = sst [smem:[#allocation68_spill]] %s638_s5  ;;  %s481_s5 = smov [#allocation7]  }
  0x93   :  { %1222 = sst [smem:[#allocation69_spill]] %s640_s22 }
  0x94   :  { %s644_s25 = sld [smem:[#allocation4 + $0x34]] }
  0x95   :  { %s646_s26 = sld [smem:[#allocation4 + $0x35]] }
  0x96   :  { %1223 = sst [smem:[#allocation70_spill]] %s642_s24 }
  0x97   :  { %s650_s27 = sld [smem:[#allocation4 + $0x3f]] }
  0x98   :  { %s656_s24 = sld [smem:[#allocation4 + $0x40]]  ;;  %v32_v0 = vpop.permute.xlu0 %31 }
  0x99   :  { %s1230_s28 = sld [smem:[#allocation33_spill]]  ;;  %v33_v48 = vsub.s32 %v648_v3, %v32_v0  ;;  %vm35_vm0 = vcmp.le.s32.totalorder %v648_v3, %v32_v0 }
  0x9a   :  { %1224 = sst [smem:[#allocation71_spill]] %s644_s25 }
  0x9b   :  { %1225 = sst [smem:[#allocation72_spill]] %s646_s26  ;;  %v751_v1 = vadd.s32 4294967294, %v33_v48 }
  0x9c   :  { %s662_s26 = sld [smem:[#allocation4 + $0x41]] }
  0x9d   :  { %1226 = sst [smem:[#allocation73_spill]] %s650_s27  ;;  %vm38_vm1 = vcmp.eq.s32.totalorder %v751_v1, 4294967295  ;;  %vm40_vm2 = vcmp.eq.s32.totalorder %v751_v1, 0  ;;  %vm44_vm3 = vcmp.eq.s32.totalorder %v751_v1, 1  ;;  %vm48_vm4 = vcmp.eq.s32.totalorder %v751_v1, 2 }
  0x9e   :  { %1227 = sst [smem:[#allocation74_spill]] %s656_s24  ;;  %vm52_vm5 = vcmp.eq.s32.totalorder %v751_v1, 3  ;;  %vm56_vm6 = vcmp.eq.s32.totalorder %v751_v1, 4  ;;  %vm60_vm7 = vcmp.eq.s32.totalorder %v751_v1, 5  ;;  %vm64_vm8 = vcmp.eq.s32.totalorder %v751_v1, 6 }
  0x9f   :  { %s1229_s27 = sld [smem:[#allocation32_spill]]  ;;  %v184_v25 = vstv %s1230_s28  ;;  %vm68_vm9 = vcmp.eq.s32.totalorder %v751_v1, 7  ;;  %vm72_vm10 = vcmp.eq.s32.totalorder %v751_v1, 8  ;;  %vm76_vm11 = vcmp.eq.s32.totalorder %v751_v1, 9 }
  0xa0   :  { %s1231_s29 = sld [smem:[#allocation34_spill]]  ;;  %vm80_vm12 = vcmp.eq.s32.totalorder %v751_v1, 10  ;;  %vm84_vm13 = vcmp.eq.s32.totalorder %v751_v1, 11  ;;  %vm88_vm14 = vcmp.eq.s32.totalorder %v751_v1, 12  ;;  %vm92_vm15 = vcmp.eq.s32.totalorder %v751_v1, 13 }
  0xa1   :  { %s1232_s30 = sld [smem:[#allocation35_spill]] }
  0xa2   :  { %1228 = sst [smem:[#allocation75_spill]] %s662_s26 }
  0xa3   :  { %s668_s6 = sld [smem:[#allocation4 + $0x42]] }
  0xa4   :  { %s1234_s24 = sld [smem:[#allocation36_spill]] }
  0xa5   :  { %s1235_s7 = sld [smem:[#allocation37_spill]]  ;;  %v181_v24 = vstv %s1229_s27 }
  0xa6   :  { %s1236_s8 = sld [smem:[#allocation38_spill]]  ;;  %v187_v26 = vstv %s1231_s29 }
  0xa7   :  { %s1237_s9 = sld [smem:[#allocation39_spill]]  ;;  %v190_v27 = vstv %s1232_s30 }
  0xa8   :  { %s674_s2 = sld [smem:[#allocation4 + $0x43]] }
  0xa9   :  { %1233 = sst [smem:[#allocation76_spill]] %s668_s6 }
  0xaa   :  { %s1239_s26 = sld [smem:[#allocation40_spill]]  ;;  %v193_v28 = vstv %s1234_s24 }
  0xab   :  { %s1240_s10 = sld [smem:[#allocation41_spill]]  ;;  %v196_v29 = vstv %s1235_s7 }
  0xac   :  { %s1241_s11 = sld [smem:[#allocation42_spill]]  ;;  %v199_v30 = vstv %s1236_s8 }
  0xad   :  { %s1242_s12 = sld [smem:[#allocation43_spill]]  ;;  %v233_v31 = vstv %s1237_s9 }
  0xae   :  { %1238 = sst [smem:[#allocation77_spill]] %s674_s2 }
  0xaf   :  { %s680_s13 = sld [smem:[#allocation4 + $0x44]] }
  0xb0   :  { %s1244_s6 = sld [smem:[#allocation44_spill]]  ;;  %v236_v32 = vstv %s1239_s26 }
  0xb1   :  { %s1245_s14 = sld [smem:[#allocation45_spill]]  ;;  %v239_v33 = vstv %s1240_s10 }
  0xb2   :  { %s1246_s15 = sld [smem:[#allocation46_spill]]  ;;  %v242_v34 = vstv %s1241_s11 }
  0xb3   :  { %s1247_s16 = sld [smem:[#allocation47_spill]]  ;;  %v245_v35 = vstv %s1242_s12 }
  0xb4   :  { %s686_s17 = sld [smem:[#allocation4 + $0x45]] }
  0xb5   :  { %1243 = sst [smem:[#allocation78_spill]] %s680_s13  ;;  %v275_v2 = vstv %s680_s13 }
  0xb6   :  { %s1249_s2 = sld [smem:[#allocation48_spill]]  ;;  %v248_v36 = vstv %s1244_s6 }
  0xb7   :  { %s1250_s18 = sld [smem:[#allocation49_spill]]  ;;  %v251_v37 = vstv %s1245_s14 }
  0xb8   :  { %s1251_s19 = sld [smem:[#allocation50_spill]]  ;;  %v254_v38 = vstv %s1246_s15 }
  0xb9   :  { %s1252_s20 = sld [smem:[#allocation51_spill]]  ;;  %v257_v39 = vstv %s1247_s16 }
  0xba   :  { %1248 = sst [smem:[#allocation79_spill]] %s686_s17  ;;  %v278_v61 = vstv %s686_s17 }
  0xbb   :  { %s692_s21 = sld [smem:[#allocation4 + $0x46]] }
  0xbc   :  { %s698_s30 = sld [smem:[#allocation4 + $0x47]]  ;;  %v78_v40 = vstv %s1249_s2 }
  0xbd   :  { %s1258_s24 = sld [smem:[#allocation57_spill]]  ;;  %v82_v41 = vstv %s1250_s18 }
  0xbe   :  { %s1259_s7 = sld [smem:[#allocation58_spill]]  ;;  %v86_v42 = vstv %s1251_s19 }
  0xbf   :  { %s704_s8 = sld [smem:[#allocation3]]  ;;  %v90_v43 = vstv %s1252_s20 }
  0xc0   :  { %s1261_s9 = sld [smem:[#allocation59_spill]] }
  0xc1   :  { %1253 = sst [smem:[#allocation48_spill]] %s692_s21  ;;  %v281_v56 = vstv %s692_s21 }
  0xc2   :  { %1256 = sst [smem:[#allocation49_spill]] %s698_s30  ;;  %v284_v53 = vstv %s698_s30 }
  0xc3   :  { %s710_s11 = sld [smem:[#allocation3 + $0x1]]  ;;  %v144_v49 = vstv %s1258_s24 }
  0xc4   :  { %s1267_s14 = sld [smem:[#allocation65_spill]]  ;;  %v147_v50 = vstv %s1259_s7 }
  0xc5   :  { %1260 = sst [smem:[#allocation58_spill]] %s704_s8 }
  0xc6   :  { %s1268_s15 = sld [smem:[#allocation66_spill]] }
  0xc7   :  { %s716_s8 = sld [smem:[#allocation3 + $0x2]] }
  0xc8   :  { %s722_s19 = sld [smem:[#allocation3 + $0x3]] }
  0xc9   :  { %1265 = sst [smem:[#allocation59_spill]] %s710_s11  ;;  %v171_v52 = vstv %s710_s11 }
  0xca   :  { %s1274_s27 = sld [smem:[#allocation73_spill]]  ;;  %v202_v58 = vstv %s1267_s14 }
  0xcb   :  { %s1275_s23 = sld [smem:[#allocation74_spill]] }
  0xcc   :  { %s1276_s28 = sld [smem:[#allocation75_spill]] }
  0xcd   :  { %1270 = sst [smem:[#allocation65_spill]] %s716_s8  ;;  %s480_s8 = smov [#allocation5]  }
  0xce   :  { %1272 = sst [smem:[#allocation66_spill]] %s722_s19  ;;  %s304_s19 = sshll.u32 %s480_s8, 4  ;;  %s305_s19 = int_to_ptr.vmem [resolvable:$true] %s304_s19 }
  0xcf   :  { %s1277_s29 = sld [smem:[#allocation76_spill]]  ;;  %s431_s26 = scalar_lea.vmem %s305_s19, 512 }
  0xd0   :  { %s1278_s24 = sld [smem:[#allocation77_spill]]  ;;  %v260_v57 = vstv %s1274_s27  ;;  %p432_p10 = scmp.ne.s32.totalorder %s305_s19, %s431_s26 }
  0xd1   :  { %s1279_s10 = sld [smem:[#allocation58_spill]]  ;;  %v263_v63 = vstv %s1275_s23  ;;  %p436_p11 = scmp.lt.s32.totalorder %s305_s19, %s305_s19 }
  0xd2   :  { %s1280_s3 = sld [smem:[#allocation80_spill]]  ;;  %v266_v62 = vstv %s1276_s28  ;;  %p437_p12 = scmp.lt.s32.totalorder %s431_s26, %s431_s26 }
  0xd3   :  { %s1321_s2 = sld [smem:[#allocation53_spill]] }
  0xd4   :  { %s1322_s18 = sld [smem:[#allocation54_spill]]  ;;  %p438_p13 = por %p437_p12, %p436_p11 }
  0xd5   :  { %v269_v54 = vstv %s1277_s29  ;;  %s1323_s4 = sld [smem:[#allocation60_spill]]  ;;  %s314_s29 = sshll.u32 %s481_s5, 4  ;;  %s315_s29 = int_to_ptr.vmem [resolvable:$true] %s314_s29 }
  0xd6   :  { %v272_v47 = vstv %s1278_s24  ;;  %s1324_s6 = sld [smem:[#allocation67_spill]]  ;;  %p439_p0 = pnand %p438_p13, %p432_p10 }
  0xd7   :  { %v113_v46 = vstv %s1279_s10  ;;  %s1326_s25 = sld [smem:[#allocation55_spill]] }
  0xd8   :  { %v36_v55 = vld [vmem:[%s1280_s3] sm:$0xff]  ;;  %s1327_s20 = sld [smem:[#allocation61_spill]] }
  0xd9   :  { %v37_v60 = vsel %vm35_vm0, %v36_v55, 1  ;;  %vm96_vm0 = vcmp.eq.s32.totalorder %v751_v1, 14  ;;  %s1328_s17 = sld [smem:[#allocation68_spill]] }
  0xda   :  { %v39_v3 = vsel %vm38_vm1, 4, %v37_v60  ;;  %vm100_vm1 = vcmp.eq.s32.totalorder %v751_v1, 15  ;;  %s1331_s7 = sld [smem:[#allocation56_spill]] }
  0xdb   :  { %v43_v48 = vsel %vm40_vm2, %v42_v4, %v39_v3  ;;  %v118_v60 = vsel %vm40_vm2, %v117_v13, %v39_v3  ;;  %v176_v4 = vsel %vm40_vm2, %v175_v22, %v39_v3  ;;  %v234_v0 = vsel %vm40_vm2, %v233_v31, %v39_v3  ;;  %s1333_s14 = sld [smem:[#allocation62_spill]] }
  0xdc   :  { %v47_v55 = vsel %vm44_vm3, %v46_v5, %v43_v48  ;;  %v121_v45 = vsel %vm44_vm3, %v120_v14, %v118_v60  ;;  %v179_v5 = vsel %vm44_vm3, %v178_v23, %v176_v4  ;;  %v237_v13 = vsel %vm44_vm3, %v236_v32, %v234_v0  ;;  %s1335_s0 = sld [smem:[#allocation69_spill]] }
  0xdd   :  { %v51_v59 = vsel %vm48_vm4, %v50_v6, %v47_v55  ;;  %v124_v14 = vsel %vm48_vm4, %v123_v15, %v121_v45  ;;  %v182_v22 = vsel %vm48_vm4, %v181_v24, %v179_v5  ;;  %v240_v23 = vsel %vm48_vm4, %v239_v33, %v237_v13  ;;  %s1338_s23 = sld [smem:[#allocation63_spill]] }
  0xde   :  { %v55_v6 = vsel %vm52_vm5, %v54_v7, %v51_v59  ;;  %v127_v15 = vsel %vm52_vm5, %v126_v16, %v124_v14  ;;  %v185_v24 = vsel %vm52_vm5, %v184_v25, %v182_v22  ;;  %v243_v31 = vsel %vm52_vm5, %v242_v34, %v240_v23  ;;  %s1340_s27 = sld [smem:[#allocation70_spill]] }
  0xdf   :  { %v59_v7 = vsel %vm56_vm6, %v58_v8, %v55_v6  ;;  %v130_v16 = vsel %vm56_vm6, %v129_v17, %v127_v15  ;;  %v188_v25 = vsel %vm56_vm6, %v187_v26, %v185_v24  ;;  %v246_v32 = vsel %vm56_vm6, %v245_v35, %v243_v31  ;;  %s1349_s30 = sld [smem:[#allocation71_spill]] }
  0xe0   :  { %v63_v8 = vsel %vm60_vm7, %v62_v9, %v59_v7  ;;  %v133_v9 = vsel %vm60_vm7, %v132_v18, %v130_v16  ;;  %v191_v17 = vsel %vm60_vm7, %v190_v27, %v188_v25  ;;  %v249_v26 = vsel %vm60_vm7, %v248_v36, %v246_v32  ;;  %s1353_s10 = sld [smem:[#allocation72_spill]] }
  0xe1   :  { %v67_v33 = vsel %vm64_vm8, %v66_v10, %v63_v8  ;;  %v136_v10 = vsel %vm64_vm8, %v135_v19, %v133_v9  ;;  %v194_v18 = vsel %vm64_vm8, %v193_v28, %v191_v17  ;;  %v252_v27 = vsel %vm64_vm8, %v251_v37, %v249_v26  ;;  %s1359_s24 = sld [smem:[#allocation65_spill]] }
  0xe2   :  { %v71_v34 = vsel %vm68_vm9, %v70_v11, %v67_v33  ;;  %v139_v11 = vsel %vm68_vm9, %v138_v20, %v136_v10  ;;  %v197_v19 = vsel %vm68_vm9, %v196_v29, %v194_v18  ;;  %v255_v28 = vsel %vm68_vm9, %v254_v38, %v252_v27  ;;  %s1361_s16 = sld [smem:[#allocation66_spill]] }
  0xe3   :  { %v75_v35 = vsel %vm72_vm10, %v74_v12, %v71_v34  ;;  %v142_v36 = vsel %vm72_vm10, %v141_v21, %v139_v11  ;;  %v200_v12 = vsel %vm72_vm10, %v199_v30, %v197_v19  ;;  %v258_v20 = vsel %vm72_vm10, %v257_v39, %v255_v28 }
  0xe4   :  { %v79_v29 = vsel %vm76_vm11, %v78_v40, %v75_v35  ;;  %vm104_vm2 = vcmp.eq.s32.totalorder %v751_v1, 16  ;;  %vm108_vm3 = vcmp.eq.s32.totalorder %v751_v1, 17  ;;  %v145_v37 = vsel %vm76_vm11, %v144_v49, %v142_v36 }
  0xe5   :  { %v83_v21 = vsel %vm80_vm12, %v82_v41, %v79_v29  ;;  %v148_v39 = vsel %vm80_vm12, %v147_v50, %v145_v37  ;;  %v203_v40 = vsel %vm76_vm11, %v202_v58, %v200_v12  ;;  %v261_v41 = vsel %vm76_vm11, %v260_v57, %v258_v20 }
  0xe6   :  { %v87_v30 = vsel %vm84_vm13, %v86_v42, %v83_v21  ;;  %v1330_v45 = vstv %s1268_s15  ;;  %v264_v50 = vsel %vm80_vm12, %v263_v63, %v261_v41  ;;  %v1332_v58 = vstv %s1321_s2 }
  0xe7   :  { %v91_v38 = vsel %vm88_vm14, %v90_v43, %v87_v30  ;;  %v151_v43 = vsel %vm84_vm13, %v150_v51, %v148_v39  ;;  %v206_v49 = vsel %vm80_vm12, %v1330_v45, %v203_v40  ;;  %v1334_v59 = vstv %s1261_s9 }
  0xe8   :  { %v95_v42 = vsel %vm92_vm15, %v94_v44, %v91_v38  ;;  %v154_v44 = vsel %vm88_vm14, %v1334_v59, %v151_v43  ;;  %v1336_v51 = vstv %s634_s1  ;;  %v267_v63 = vsel %vm84_vm13, %v266_v62, %v264_v50  ;;  %s1348_s1 = sld [smem:[#allocation64_spill]] }
  0xe9   :  { %v99_v57 = vsel %vm96_vm0, %v1332_v58, %v95_v42  ;;  %v209_v3 = vsel %vm84_vm13, %v1336_v51, %v206_v49  ;;  %v1339_v48 = vstv %s1322_s18  ;;  %v1341_v60 = vstv %s1323_s4 }
  0xea   :  { %v103_v55 = vsel %vm100_vm1, %v1339_v48, %v99_v57  ;;  %v157_v4 = vsel %vm92_vm15, %v1341_v60, %v154_v44  ;;  %v1343_v0 = vstv %s1324_s6  ;;  %v270_v13 = vsel %vm88_vm14, %v269_v54, %v267_v63 }
  0xeb   :  { %v212_v5 = vsel %vm88_vm14, %v1343_v0, %v209_v3  ;;  %v1345_v62 = vstv %s1326_s25  ;;  %v1346_v14 = vstv %s1327_s20  ;;  %v1347_v23 = vstv %s1328_s17 }
  0xec   :  { %v107_v6 = vsel %vm104_vm2, %v1345_v62, %v103_v55  ;;  %v160_v22 = vsel %vm96_vm0, %v1346_v14, %v157_v4  ;;  %v215_v7 = vsel %vm92_vm15, %v1347_v23, %v212_v5  ;;  %v273_v15 = vsel %vm92_vm15, %v272_v47, %v270_v13 }
  0xed   :  { %v1351_v54 = vstv %s1331_s7  ;;  %v1352_v31 = vstv %s1333_s14  ;;  %v1354_v16 = vstv %s1335_s0  ;;  %v276_v47 = vsel %vm96_vm0, %v275_v2, %v273_v15 }
  0xee   :  { %v111_v24 = vsel %vm108_vm3, %v1351_v54, %v107_v6  ;;  %v163_v8 = vsel %vm100_vm1, %v1352_v31, %v160_v22  ;;  %v218_v25 = vsel %vm96_vm0, %v1354_v16, %v215_v7  ;;  %v1356_v32 = vstv %s1338_s23 }
  0xef   :  { %v166_v33 = vsel %vm104_vm2, %v1356_v32, %v163_v8  ;;  %v1358_v9 = vstv %s1340_s27  ;;  %v279_v26 = vsel %vm100_vm1, %v278_v61, %v276_v47  ;;  %290 = vst [vmem:[#allocation5] sm:$0xff] %v111_v24  ;;  %vm114_vm4 = vcmp.lt.s32.totalorder %v751_v1, %v113_v46 }
  0xf0   :  { %v221_v17 = vsel %vm100_vm1, %v1358_v9, %v218_v25  ;;  %v1360_v2 = vstv %s1348_s1  ;;  %v1362_v10 = vstv %s1349_s30  ;;  %v282_v27 = vsel %vm104_vm2, %v281_v56, %v279_v26 }
  0xf1   :  { %v169_v34 = vsel %vm108_vm3, %v1360_v2, %v166_v33  ;;  %v224_v18 = vsel %vm104_vm2, %v1362_v10, %v221_v17  ;;  %v1363_v61 = vmov 0   ;;  %v1364_v11 = vstv %s1353_s10 }
  0xf2   :  { %v115_v35 = vsel %vm114_vm4, 1, %v1363_v61  ;;  %v227_v46 = vsel %vm108_vm3, %v1364_v11, %v224_v18  ;;  %v285_v19 = vsel %vm108_vm3, %v284_v53, %v282_v27  ;;  %291 = vst [vmem:[#allocation5 + $0x8] sm:$0xff] %v169_v34  ;;  %vm172_vm5 = vcmp.lt.s32.totalorder %v751_v1, %v171_v52 }
  0xf3   :  { %v1365_v28 = vstv %s1359_s24  ;;  %294 = vst [vmem:[#allocation7] sm:$0xff] %v115_v35  ;;  %292 = vst [vmem:[#allocation5 + $0x10] sm:$0xff] %v227_v46  ;;  %v173_v56 = vsel %vm172_vm5, 1, %v1363_v61  ;;  %v1366_v12 = vstv %s1361_s16 }
  0xf4   :  { %vm230_vm6 = vcmp.lt.s32.totalorder %v751_v1, %v1365_v28  ;;  %293 = vst [vmem:[#allocation5 + $0x18] sm:$0xff] %v285_v19  ;;  %vm288_vm7 = vcmp.lt.s32.totalorder %v751_v1, %v1366_v12 }
  0xf5   :  { %v231_v36 = vsel %vm230_vm6, 1, %v1363_v61 }
  0xf6   :  { %442 = shalt.err (!%p439_p0)
}
  0xf7   :  { %s1367_s18 = sld [smem:[#allocation81_spill]]  ;;  %v289_v52 = vsel %vm288_vm7, 1, %v1363_v61  ;;  %295 = vst [vmem:[#allocation7 + $0x8] sm:$0xff] %v173_v56  ;;  %296 = vst [vmem:[#allocation7 + $0x10] sm:$0xff] %v231_v36  ;;  %s451_s4 = scalar_lea.vmem %s315_s29, 512 }
  0xf8   :  { %297 = vst [vmem:[#allocation7 + $0x18] sm:$0xff] %v289_v52  ;;  %p452_p1 = scmp.ne.s32.totalorder %s315_s29, %s451_s4  ;;  %p456_p2 = scmp.lt.s32.totalorder %s315_s29, %s315_s29 }
  0xf9   :  { %p457_p3 = scmp.lt.s32.totalorder %s451_s4, %s451_s4 }
  0xfb   :  { %p458_p4 = por %p457_p3, %p456_p2 }
  0xfd   :  { %307 = dma.vmem_to_hbm [thread:$0]  %s305_s19, 512, %s1367_s18, [#allocation6]  }
  0xfe   :  { %p459_p5 = pnand %p458_p4, %p452_p1 }
 0x100   :  { %462 = shalt.err (!%p459_p5)
}
 0x101   :  { %s1368_s25 = sld [smem:[#allocation82_spill]] }
 0x107   :  { %317 = dma.vmem_to_hbm [thread:$0]  %s315_s29, 512, %s1368_s25, [#allocation8]  }
 0x108   :  { %473 = dma.done.wait [#allocation6], 512  }
 0x109   :  { %474 = vsyncadd [#allocation6], 4294966784 }
 0x10a   :  { %475 = dma.done.wait [#allocation8], 512  }
 0x10b   :  { %476 = vsyncadd [#allocation8], 4294966784 }
 0x10c   :  { %324 = vsyncpa [#allocation6], 1 }
 0x10d   :  { %325 = vsyncpa [#allocation8], 1 }

</bundles_post_ra>
